<compile_context>
chip_gen: v5e
topology: v5e:2x2
jax: 0.10.0
libtpu: 0.0.40
codegen_flags: <defaults>
</compile_context>

<pallas_src>
import functools

import jax
import jax.numpy as jnp
from jax import lax
from jax.experimental import pallas as pl
from jax.experimental.pallas import tpu as pltpu


def _round_up(x, m):
    return (x + m - 1) // m * m


def _two_model_kernel(src_ref, tgt_ref,
                      enc_w_ref, enc_b_ref,
                      dec_wt_ref, dec_wc_ref, dec_b_ref,
                      gen_w_ref, gen_b_ref,
                      out_ref,
                      *, s_true, s_pad):
    # src_ref: (Sp, Hp) bf16, tgt_ref: (Tp, Hp) bf16 -- one batch element per
    # grid step.  Weights bf16, biases f32, out (Tp, Vp) f32.

    # ---- encoder: per-position linear + tanh -------------------------------
    enc = jnp.tanh(
        jnp.dot(src_ref[...], enc_w_ref[...],
                preferred_element_type=jnp.float32)
        + enc_b_ref[...])                                    # (Sp, Hp) f32

    # per-batch mean-pooled source context; mask padded rows only when needed
    if s_pad == s_true:
        ctx = jnp.mean(enc, axis=0, keepdims=True)           # (1, Hp) f32
    else:
        row = lax.broadcasted_iota(jnp.int32, enc.shape, 0)  # VPU, cheap
        ctx = (jnp.sum(jnp.where(row < s_true, enc, 0.0),
                       axis=0, keepdims=True)
               * (1.0 / float(s_true)))                      # (1, Hp) f32

    # project context BEFORE broadcasting over target length; fold decoder bias
    ctx_proj = (jnp.dot(ctx.astype(jnp.bfloat16), dec_wc_ref[...],
                        preferred_element_type=jnp.float32)
                + dec_b_ref[...])                            # (1, Hp) f32

    # ---- decoder ------------------------------------------------------------
    dec = jnp.tanh(
        jnp.dot(tgt_ref[...], dec_wt_ref[...],
                preferred_element_type=jnp.float32)
        + ctx_proj)                                          # (Tp, Hp) f32

    # ---- generator: projection to (padded) vocab + log_softmax -------------
    logits = (jnp.dot(dec.astype(jnp.bfloat16), gen_w_ref[...],
                      preferred_element_type=jnp.float32)
              + gen_b_ref[...])                              # (Tp, Vp) f32
    m = jnp.max(logits, axis=-1, keepdims=True)              # XLU lane reduce
    e = jnp.exp(logits - m)                                  # EUP
    lse = jnp.log(jnp.sum(e, axis=-1, keepdims=True)) + m
    out_ref[...] = logits - lse


def two_model_forward(src_emb, tgt_emb, params):
    """src_emb: (B,S,H), tgt_emb: (B,T,H) -> log-probs (B,T,V)."""
    B, S, H = src_emb.shape
    _, T, _ = tgt_emb.shape
    V = params["gen_w"].shape[1]
    Hp = _round_up(H, 128)
    Vp = _round_up(V, 128)
    Sp = _round_up(S, 8)
    Tp = _round_up(T, 8)

    def pad2(x, r, c):
        return jnp.pad(x, ((0, r - x.shape[0]), (0, c - x.shape[1])))

    # Per-batch row padding (sublane) + lane padding, bf16 matmul operands.
    src2d = jnp.pad(src_emb, ((0, 0), (0, Sp - S), (0, Hp - H))
                    ).reshape(B * Sp, Hp).astype(jnp.bfloat16)
    tgt2d = jnp.pad(tgt_emb, ((0, 0), (0, Tp - T), (0, Hp - H))
                    ).reshape(B * Tp, Hp).astype(jnp.bfloat16)

    enc_w = pad2(params["enc_w"], Hp, Hp).astype(jnp.bfloat16)
    enc_b = pad2(params["enc_b"], 1, Hp)
    dec_wt = pad2(params["dec_wt"], Hp, Hp).astype(jnp.bfloat16)
    dec_wc = pad2(params["dec_wc"], Hp, Hp).astype(jnp.bfloat16)
    dec_b = pad2(params["dec_b"], 1, Hp)
    gen_w = pad2(params["gen_w"], Hp, Vp).astype(jnp.bfloat16)
    # padded vocab columns get a huge negative bias so they vanish under the
    # max-stabilized log-softmax (exp underflows to 0 -> normalizer unchanged)
    gen_b = jnp.pad(params["gen_b"], ((0, 0), (0, Vp - V)),
                    constant_values=-1e30)

    full_w = lambda shape: pl.BlockSpec(shape, lambda b: (0, 0))

    kernel = functools.partial(_two_model_kernel, s_true=S, s_pad=Sp)

    out = pl.pallas_call(
        kernel,
        out_shape=jax.ShapeDtypeStruct((B * Tp, Vp), jnp.float32),
        grid=(B,),
        in_specs=[
            pl.BlockSpec((Sp, Hp), lambda b: (b, 0)),  # src rows of batch b
            pl.BlockSpec((Tp, Hp), lambda b: (b, 0)),  # tgt rows of batch b
            full_w((Hp, Hp)), full_w((1, Hp)),         # encoder W, b
            full_w((Hp, Hp)), full_w((Hp, Hp)),        # decoder W_tgt, W_ctx
            full_w((1, Hp)),                           # decoder b
            full_w((Hp, Vp)), full_w((1, Vp)),         # generator W, b
        ],
        out_specs=pl.BlockSpec((Tp, Vp), lambda b: (b, 0)),
        compiler_params=pltpu.CompilerParams(
            dimension_semantics=("parallel",)),        # megacore over batch
    )(src2d, tgt2d, enc_w, enc_b, dec_wt, dec_wc, dec_b, gen_w, gen_b)

    return out.reshape(B, Tp, Vp)[:, :T, :V]


def init_params(key, vocab, hidden, param_init=0.1):
    """Deterministic equivalent of SimpleModel/TwoModel.initialize(0.1)."""
    ks = jax.random.split(key, 12)
    u = lambda k, shape: jax.random.uniform(
        k, shape, jnp.float32, -param_init, param_init)

    p = {
        # embedding tables (encoder / decoder regular + special)
        "enc_emb": u(ks[0], (vocab, hidden)),
        "enc_special_emb": u(ks[1], (vocab, hidden)),
        "dec_emb": u(ks[2], (vocab, hidden)),
        "dec_special_emb": u(ks[3], (vocab, hidden)),
        # encoder / decoder / generator linear params
        "enc_w": u(ks[4], (hidden, hidden)),
        "enc_b": u(ks[5], (1, hidden)),
        "dec_wt": u(ks[6], (hidden, hidden)),
        "dec_wc": u(ks[7], (hidden, hidden)),
        "dec_b": u(ks[8], (1, hidden)),
        "gen_w": u(ks[9], (hidden, vocab)),
        "gen_b": u(ks[10], (1, vocab)),
    }
    # self.encoder.special_embeddings.weight.data[0] *= 0  (and decoder's)
    p["enc_special_emb"] = p["enc_special_emb"].at[0].set(0.0)
    p["dec_special_emb"] = p["dec_special_emb"].at[0].set(0.0)
    return p


def embed(ids, special_ids, table, special_table):
    # glue: gather + add of special embeddings (row 0 == "no special" == zeros)
    return (jnp.take(table, ids, axis=0)
            + jnp.take(special_table, special_ids, axis=0))


if __name__ == "__main__":
    B, S, T, H, V = 2, 8, 8, 32, 64

    key = jax.random.PRNGKey(0)
    k_params, k_src, k_tgt, k_ssp, k_tsp = jax.random.split(key, 5)

    params = init_params(k_params, vocab=V, hidden=H)

    src_ids = jax.random.randint(k_src, (B, S), 0, V)
    tgt_ids = jax.random.randint(k_tgt, (B, T), 0, V)
    # special-token ids; 0 means "none" (embedding row 0 is zeroed)
    src_special = jax.random.randint(k_ssp, (B, S), 0, 4)
    tgt_special = jax.random.randint(k_tsp, (B, T), 0, 4)

    src_emb = embed(src_ids, src_special,
                    params["enc_emb"], params["enc_special_emb"])
    tgt_emb = embed(tgt_ids, tgt_special,
                    params["dec_emb"], params["dec_special_emb"])

    out = two_model_forward(src_emb, tgt_emb, params)
    jax.block_until_ready(out)

    assert out.shape == (B, T, V)
    assert bool(jnp.all(jnp.isfinite(out)))
    # each row of log-probs should (approximately) sum to 1 after exp
    assert bool(jnp.allclose(jnp.sum(jnp.exp(out), axis=-1), 1.0, atol=1e-4))
    print("KERNEL_OK")
</pallas_src>

<mosaic_0001>
module attributes {stable_mosaic.version = 11 : i64} {
  func.func @_two_model_kernel(%arg0: i32, %arg1: memref<8x128xbf16, #tpu.memory_space<vmem>>, %arg2: memref<8x128xbf16, #tpu.memory_space<vmem>>, %arg3: memref<128x128xbf16, #tpu.memory_space<vmem>>, %arg4: memref<1x128xf32, #tpu.memory_space<vmem>>, %arg5: memref<128x128xbf16, #tpu.memory_space<vmem>>, %arg6: memref<128x128xbf16, #tpu.memory_space<vmem>>, %arg7: memref<1x128xf32, #tpu.memory_space<vmem>>, %arg8: memref<128x128xbf16, #tpu.memory_space<vmem>>, %arg9: memref<1x128xf32, #tpu.memory_space<vmem>>, %arg10: memref<8x128xf32, #tpu.memory_space<vmem>>) attributes {dimension_semantics = [#tpu.dimension_semantics<parallel>], iteration_bounds = array<i64: 2>, scalar_prefetch = 0 : i64, scratch_operands = 0 : i64, tpu.core_type = #tpu.core_type<tc>, window_params = [{transform_indices = @transform_0, window_bounds = array<i64: 8, 128>}, {transform_indices = @transform_1, window_bounds = array<i64: 8, 128>}, {pipeline_mode = #tpu.pipeline_mode<synchronous>, transform_indices = @transform_2, window_bounds = array<i64: 128, 128>}, {pipeline_mode = #tpu.pipeline_mode<synchronous>, transform_indices = @transform_3, window_bounds = array<i64: 1, 128>}, {pipeline_mode = #tpu.pipeline_mode<synchronous>, transform_indices = @transform_4, window_bounds = array<i64: 128, 128>}, {pipeline_mode = #tpu.pipeline_mode<synchronous>, transform_indices = @transform_5, window_bounds = array<i64: 128, 128>}, {pipeline_mode = #tpu.pipeline_mode<synchronous>, transform_indices = @transform_6, window_bounds = array<i64: 1, 128>}, {pipeline_mode = #tpu.pipeline_mode<synchronous>, transform_indices = @transform_7, window_bounds = array<i64: 128, 128>}, {pipeline_mode = #tpu.pipeline_mode<synchronous>, transform_indices = @transform_8, window_bounds = array<i64: 1, 128>}, {transform_indices = @transform_9, window_bounds = array<i64: 8, 128>}]} {
    %c0 = arith.constant 0 : index
    %c0_0 = arith.constant 0 : index
    %0 = vector.load %arg1[%c0, %c0_0] : memref<8x128xbf16, #tpu.memory_space<vmem>>, vector<8x128xbf16>
    %c0_1 = arith.constant 0 : index
    %c0_2 = arith.constant 0 : index
    %1 = vector.load %arg3[%c0_1, %c0_2] : memref<128x128xbf16, #tpu.memory_space<vmem>>, vector<128x128xbf16>
    %cst = arith.constant dense<0.000000e+00> : vector<8x128xf32>
    %2 = tpu.matmul %0, %1, %cst {dimension_numbers = #tpu.dot_dimension_numbers<[1], [0], [0], [1], [0, 0, 1, 1], [], []>} : vector<8x128xbf16>, vector<128x128xbf16>, vector<8x128xf32> -> vector<8x128xf32>
    %c0_3 = arith.constant 0 : index
    %c0_4 = arith.constant 0 : index
    %3 = vector.load %arg4[%c0_3, %c0_4] : memref<1x128xf32, #tpu.memory_space<vmem>>, vector<1x128xf32>
    %4 = vector.broadcast %3 : vector<1x128xf32> to vector<8x128xf32>
    %5 = arith.addf %2, %4 : vector<8x128xf32>
    %6 = math.tanh %5 : vector<8x128xf32>
    %cst_5 = arith.constant dense<0.000000e+00> : vector<128xf32>
    %7 = vector.multi_reduction <add>, %6, %cst_5 [0] : vector<8x128xf32> to vector<128xf32>
    %8 = vector.shape_cast %7 : vector<128xf32> to vector<1x128xf32>
    %cst_6 = arith.constant 8.000000e+00 : f32
    %9 = vector.broadcast %cst_6 : f32 to vector<1x128xf32>
    %10 = arith.divf %8, %9 : vector<1x128xf32>
    %11 = arith.truncf %10 : vector<1x128xf32> to vector<1x128xbf16>
    %c0_7 = arith.constant 0 : index
    %c0_8 = arith.constant 0 : index
    %12 = vector.load %arg6[%c0_7, %c0_8] : memref<128x128xbf16, #tpu.memory_space<vmem>>, vector<128x128xbf16>
    %cst_9 = arith.constant dense<0.000000e+00> : vector<1x128xf32>
    %13 = tpu.matmul %11, %12, %cst_9 {dimension_numbers = #tpu.dot_dimension_numbers<[1], [0], [0], [1], [0, 0, 1, 1], [], []>} : vector<1x128xbf16>, vector<128x128xbf16>, vector<1x128xf32> -> vector<1x128xf32>
    %c0_10 = arith.constant 0 : index
    %c0_11 = arith.constant 0 : index
    %14 = vector.load %arg7[%c0_10, %c0_11] : memref<1x128xf32, #tpu.memory_space<vmem>>, vector<1x128xf32>
    %15 = arith.addf %13, %14 : vector<1x128xf32>
    %c0_12 = arith.constant 0 : index
    %c0_13 = arith.constant 0 : index
    %16 = vector.load %arg2[%c0_12, %c0_13] : memref<8x128xbf16, #tpu.memory_space<vmem>>, vector<8x128xbf16>
    %c0_14 = arith.constant 0 : index
    %c0_15 = arith.constant 0 : index
    %17 = vector.load %arg5[%c0_14, %c0_15] : memref<128x128xbf16, #tpu.memory_space<vmem>>, vector<128x128xbf16>
    %cst_16 = arith.constant dense<0.000000e+00> : vector<8x128xf32>
    %18 = tpu.matmul %16, %17, %cst_16 {dimension_numbers = #tpu.dot_dimension_numbers<[1], [0], [0], [1], [0, 0, 1, 1], [], []>} : vector<8x128xbf16>, vector<128x128xbf16>, vector<8x128xf32> -> vector<8x128xf32>
    %19 = vector.broadcast %15 : vector<1x128xf32> to vector<8x128xf32>
    %20 = arith.addf %18, %19 : vector<8x128xf32>
    %21 = math.tanh %20 : vector<8x128xf32>
    %22 = arith.truncf %21 : vector<8x128xf32> to vector<8x128xbf16>
    %c0_17 = arith.constant 0 : index
    %c0_18 = arith.constant 0 : index
    %23 = vector.load %arg8[%c0_17, %c0_18] : memref<128x128xbf16, #tpu.memory_space<vmem>>, vector<128x128xbf16>
    %cst_19 = arith.constant dense<0.000000e+00> : vector<8x128xf32>
    %24 = tpu.matmul %22, %23, %cst_19 {dimension_numbers = #tpu.dot_dimension_numbers<[1], [0], [0], [1], [0, 0, 1, 1], [], []>} : vector<8x128xbf16>, vector<128x128xbf16>, vector<8x128xf32> -> vector<8x128xf32>
    %c0_20 = arith.constant 0 : index
    %c0_21 = arith.constant 0 : index
    %25 = vector.load %arg9[%c0_20, %c0_21] : memref<1x128xf32, #tpu.memory_space<vmem>>, vector<1x128xf32>
    %26 = vector.broadcast %25 : vector<1x128xf32> to vector<8x128xf32>
    %27 = arith.addf %24, %26 : vector<8x128xf32>
    %cst_22 = arith.constant dense<0xFF800000> : vector<8xf32>
    %28 = vector.multi_reduction <maximumf>, %27, %cst_22 [1] : vector<8x128xf32> to vector<8xf32>
    %29 = vector.shape_cast %28 : vector<8xf32> to vector<8x1xf32>
    %30 = vector.broadcast %29 : vector<8x1xf32> to vector<8x128xf32>
    %31 = arith.subf %27, %30 : vector<8x128xf32>
    %32 = math.exp %31 : vector<8x128xf32>
    %cst_23 = arith.constant dense<0.000000e+00> : vector<8xf32>
    %33 = vector.multi_reduction <add>, %32, %cst_23 [1] : vector<8x128xf32> to vector<8xf32>
    %34 = vector.shape_cast %33 : vector<8xf32> to vector<8x1xf32>
    %35 = math.log %34 : vector<8x1xf32>
    %36 = arith.addf %35, %29 : vector<8x1xf32>
    %37 = vector.broadcast %36 : vector<8x1xf32> to vector<8x128xf32>
    %38 = arith.subf %27, %37 : vector<8x128xf32>
    %c0_24 = arith.constant 0 : index
    %c0_25 = arith.constant 0 : index
    %39 = vector.load %arg10[%c0_24, %c0_25] : memref<8x128xf32, #tpu.memory_space<vmem>>, vector<8x128xf32>
    tpu.vector_store %arg10[%c0_24, %c0_25], %38 {strides = array<i32>} : memref<8x128xf32, #tpu.memory_space<vmem>>, vector<8x128xf32>,
    return
  }
  func.func @transform_0(%arg0: i32) -> (i32, i32) {
    %c0_i32 = arith.constant 0 : i32
    %c0_i32_0 = arith.constant 0 : i32
    return %arg0, %c0_i32 : i32, i32
  }
  func.func @transform_1(%arg0: i32) -> (i32, i32) {
    %c0_i32 = arith.constant 0 : i32
    %c0_i32_0 = arith.constant 0 : i32
    return %arg0, %c0_i32 : i32, i32
  }
  func.func @transform_2(%arg0: i32) -> (i32, i32) {
    %c0_i32 = arith.constant 0 : i32
    %c0_i32_0 = arith.constant 0 : i32
    %c0_i32_1 = arith.constant 0 : i32
    return %c0_i32, %c0_i32_0 : i32, i32
  }
  func.func @transform_3(%arg0: i32) -> (i32, i32) {
    %c0_i32 = arith.constant 0 : i32
    %c0_i32_0 = arith.constant 0 : i32
    %c0_i32_1 = arith.constant 0 : i32
    return %c0_i32, %c0_i32_0 : i32, i32
  }
  func.func @transform_4(%arg0: i32) -> (i32, i32) {
    %c0_i32 = arith.constant 0 : i32
    %c0_i32_0 = arith.constant 0 : i32
    %c0_i32_1 = arith.constant 0 : i32
    return %c0_i32, %c0_i32_0 : i32, i32
  }
  func.func @transform_5(%arg0: i32) -> (i32, i32) {
    %c0_i32 = arith.constant 0 : i32
    %c0_i32_0 = arith.constant 0 : i32
    %c0_i32_1 = arith.constant 0 : i32
    return %c0_i32, %c0_i32_0 : i32, i32
  }
  func.func @transform_6(%arg0: i32) -> (i32, i32) {
    %c0_i32 = arith.constant 0 : i32
    %c0_i32_0 = arith.constant 0 : i32
    %c0_i32_1 = arith.constant 0 : i32
    return %c0_i32, %c0_i32_0 : i32, i32
  }
  func.func @transform_7(%arg0: i32) -> (i32, i32) {
    %c0_i32 = arith.constant 0 : i32
    %c0_i32_0 = arith.constant 0 : i32
    %c0_i32_1 = arith.constant 0 : i32
    return %c0_i32, %c0_i32_0 : i32, i32
  }
  func.func @transform_8(%arg0: i32) -> (i32, i32) {
    %c0_i32 = arith.constant 0 : i32
    %c0_i32_0 = arith.constant 0 : i32
    %c0_i32_1 = arith.constant 0 : i32
    return %c0_i32, %c0_i32_0 : i32, i32
  }
  func.func @transform_9(%arg0: i32) -> (i32, i32) {
    %c0_i32 = arith.constant 0 : i32
    %c0_i32_0 = arith.constant 0 : i32
    return %arg0, %c0_i32 : i32, i32
  }
}

</mosaic_0001>

<bundles_post_ra>
// kernel: tpu_custom_call.1
= control target key start
LH: loop header
LB: loop body
LE: loop exit
PB: predicated region body
PF: predicated region fallthrough
CT: control target
= control target key end

     0   :  { %s1777_s0 = inlined_call_operand.hbm [shape: bf16[16,128], index: 0, kind: input, shape index: {}]   ;;  %s1778_s1 = inlined_call_operand.hbm [shape: bf16[16,128], index: 1, kind: input, shape index: {}]   ;;  %s1779_s2 = inlined_call_operand.hbm [shape: bf16[128,128], index: 2, kind: input, shape index: {}]   ;;  %s1780_s3 = inlined_call_operand.vmem [shape: f32[1,128], index: 3, kind: input, shape index: {}]   ;;  %s1781_s4 = inlined_call_operand.hbm [shape: bf16[128,128], index: 4, kind: input, shape index: {}]   ;;  %s1782_s5 = inlined_call_operand.hbm [shape: bf16[128,128], index: 5, kind: input, shape index: {}]   ;;  %s1783_s6 = inlined_call_operand.vmem [shape: f32[1,128], index: 6, kind: input, shape index: {}]   ;;  %s1784_s7 = inlined_call_operand.hbm [shape: bf16[128,128], index: 7, kind: input, shape index: {}]   ;;  %s1785_s8 = inlined_call_operand.vmem [shape: f32[1,128], index: 8, kind: input, shape index: {}]   ;;  %s1786_s9 = inlined_call_operand.hbm [shape: f32[16,128], index: 9, kind: output, shape index: {}]  }
   0x1   :  { %1791 = sst [smem:[#allocation24_spill]] %s1779_s2 }
   0x2   :  { %1792 = sst [smem:[#allocation25_spill]] %s1781_s4 }
   0x3   :  { %1793 = sst [smem:[#allocation26_spill]] %s1782_s5 }
   0x4   :  { %1794 = sst [smem:[#allocation27_spill]] %s1784_s7 }
   0x5   :  { %14 = vsyncpa [#allocation3], 0 }
   0x6   :  { %16 = vsyncpa [#allocation3 + $0x1], 0 }
   0x7   :  { %17 = vsyncpa [#allocation6], 0 }
   0x8   :  { %19 = vsyncpa [#allocation6 + $0x1], 0 }
   0x9   :  { %20 = vsyncpa [#allocation9], 0 }
   0xa   :  { %21 = vsyncpa [#allocation12], 0 }
   0xb   :  { %22 = vsyncpa [#allocation4], 0 }
   0xc   :  { %24 = vsyncpa [#allocation4 + $0x1], 0  ;;  %s1563_s30 = smov 0   ;;  %s1565_s10 = smov 0  }
   0xd   :  { %s1567_s11 = smov 0   ;;  %s1569_s12 = smov 0  }
   0xe LB: > { %1795 = sst [smem:[#allocation20_spill]] %s1500_s11  ;;  %s1587_s16 = sadd.s32 4294967295, %s1504_s12   ;;  %s1504_s12 = sphi %s1569_s12, %s1812_s12   ;;  %s1500_s11 = sphi %s1567_s11, %s1814_s11   ;;  %s1496_s10 = sphi %s1565_s10, %s1816_s10   ;;  %s1492_s30 = sphi %s1563_s30, %s1815_s30  }
   0xf   : > { %1796 = sst [smem:[#allocation21_spill]] %s1504_s12  ;;  %p953_p0 = scmp.ge.s32.totalorder %s1504_s12, 1 }
  0x10   : > { %s1797_s2 = sld [smem:[#allocation24_spill]]  ;;  %p51_p1 = scmp.eq.s32.totalorder %s1587_s16, 0 }
  0x11   : > { %p260_p2 = scmp.lt.s32.totalorder %s1504_s12, 3  ;;  %s1506_s18 = smov [#allocation7]  }
  0x12   : > { %s273_s19 = sshll.u32 %s1506_s18, 4  ;;  %s1799_s4 = sld [smem:[#allocation25_spill]]  ;;  %s274_s19 = int_to_ptr.vmem [resolvable:$true] %s273_s19 }
  0x13   : > { %p1592_p3 = pnand %p953_p0, %p260_p2  ;;  %s1801_s5 = sld [smem:[#allocation26_spill]] }
  0x14   : > { %s1507_s27 = smov [#allocation8]   ;;  %s1508_s29 = smov 64  }
  0x15   : > { %p1157_p4 = pneg %p1592_p3  ;;  %s290_s28 = sshll.u32 %s1507_s27, 4  ;;  %s291_s28 = int_to_ptr.vmem [resolvable:$true] %s290_s28 }
  0x16   : > { %s271_s15 = sshll.u32 %s1797_s2, 4  ;;  %s1509_s13 = smov 4   ;;  %s272_s15 = int_to_ptr.hbm [resolvable:$true] %s271_s15 }
  0x17   : > { %p1604_p6 = pnand %p1157_p4, %p51_p1  ;;  %s1802_s7 = sld [smem:[#allocation27_spill]] }
  0x18   : > { %s288_s22 = sshll.u32 %s1799_s4, 4  ;;  %s1510_s21 = smov [#allocation10]   ;;  %s289_s22 = int_to_ptr.hbm [resolvable:$true] %s288_s22 }
  0x19   : > { %s302_s26 = sshll.u32 %s1801_s5, 4  ;;  %s304_s24 = sshll.u32 %s1510_s21, 4  ;;  %s303_s26 = int_to_ptr.hbm [resolvable:$true] %s302_s26  ;;  %s305_s24 = int_to_ptr.vmem [resolvable:$true] %s304_s24 }
  0x1a   : > { %1160 = dma.hbm_to_vmem [thread:$0]  (!%p1604_p6), %s272_s15, 1024, %s274_s19, [#allocation6], %s1508_s29, %s1508_s29, %s1509_s13  }
  0x1b   : > { %1163 = dma.hbm_to_vmem [thread:$0]  (!%p1604_p6), %s289_s22, 1024, %s291_s28, [#allocation9], %s1508_s29, %s1508_s29, %s1509_s13  }
  0x1c   : > { %1166 = dma.hbm_to_vmem [thread:$0]  (!%p1604_p6), %s303_s26, 1024, %s305_s24, [#allocation9], %s1508_s29, %s1508_s29, %s1509_s13  }
  0x1d   : > { %s319_s20 = sshll.u32 %s1802_s7, 4  ;;  %s1511_s15 = smov [#allocation11]   ;;  %s320_s20 = int_to_ptr.hbm [resolvable:$true] %s319_s20 }
  0x1e   : > { %s321_s19 = sshll.u32 %s1511_s15, 4  ;;  %s952_s22 = sadd.s32 4294967294, %s1504_s12   ;;  %s322_s19 = int_to_ptr.vmem [resolvable:$true] %s321_s19 }
  0x1f   : > { %1169 = dma.hbm_to_vmem [thread:$0]  (!%p1604_p6), %s320_s20, 1024, %s322_s19, [#allocation12], %s1508_s29, %s1508_s29, %s1509_s13  }
  0x20   : > { %s1624_s25 = sadd.s32 1, %s1504_s12   ;;  %s37_s28 = sadd.s32 1, %s1500_s11 }
  0x21   : > { %1803 = sst [smem:[#allocation22_spill]] %s1624_s25  ;;  %s34_s27 = ssub.s32 %s1504_s12, %s1624_s25 }
  0x22   : > { %p35_p7 = scmp.eq.s32.totalorder %s34_s27, 0  ;;  %p44_p8 = scmp.ne.s32.totalorder %s1500_s11, %s1496_s10 }
  0x23   : > { %p45_p9 = scmp.eq.s32.totalorder %s1504_s12, 0  ;;  %p50_p10 = scmp.ne.s32.totalorder %s1496_s10, %s1492_s30 }
  0x24   : > { %s1635_s26 = scalar_select %p35_p7, %s1500_s11, %s37_s28  }
  0x25   : > { %p1637_p11 = por %p45_p9, %p44_p8  ;;  %p1643_p12 = por %p51_p1, %p50_p10 }
  0x26   : > { %1804 = sst [smem:[#allocation23_spill]] %s1635_s26  ;;  %p247_p13 = scmp.eq.s32.totalorder %s1587_s16, 1 }
  0x27   : > { %p253_p0 = scmp.eq.s32.totalorder %s952_s22, 1  ;;  %p1185_p2 = scmp.lt.s32.totalorder %s1504_s12, 2 }
  0x28   : > { %s338_s29 = sand.u32 1, %s1500_s11   ;;  %p1650_p4 = por %p247_p13, %p44_p8 }
  0x29   : > { %p1654_p6 = por %p253_p0, %p50_p10  ;;  %s1658_s20 = sshll.u32 %s338_s29, 2 }
  0x2a   : > { %s960_s21 = sshll.u32 %s1504_s12, 2  ;;  %s342_s27 = scalar_lea.vmem [#allocation2], %s1658_s20 }
  0x2b   : > { %s346_s19 = scalar_lea.hbm %s1777_s0, %s960_s21  ;;  %s350_s22 = sshll.u32 %s342_s27, 4  ;;  %s351_s22 = int_to_ptr.vmem [resolvable:$true] %s350_s22 }
  0x2c   : > { %s348_s28 = sshll.u32 %s346_s19, 4  ;;  %p1667_p7 = pnand %p1185_p2, %p1637_p11  ;;  %s349_s28 = int_to_ptr.hbm [resolvable:$true] %s348_s28 }
  0x2d   : > { %s365_s7 = scalar_lea.hbm %s1778_s1, %s960_s21  ;;  %s357_s26 = sand.u32 1, %s1504_s12  }
  0x2e   : > { %s339_s11 = scalar_lea.sflag [#allocation3], %s338_s29  ;;  %s1362_s24 = sshra.s32 %s349_s28, 4  ;;  %s1363_s24 = int_to_ptr.hbm [resolvable:$true] %s1362_s24 }
  0x2f   : > { %s1364_s15 = scalar_lea.hbm %s1363_s24, 4  ;;  %p1366_p9 = pneg %p1667_p7 }
  0x30   : > { %p1365_p8 = scmp.ne.s32.totalorder %s1363_s24, %s1364_s15  ;;  %s1369_s27 = scalar_lea.hbm %s1777_s0, 8 }
  0x31   : > { %p1370_p13 = scmp.lt.s32.totalorder %s1363_s24, %s1777_s0  ;;  %p1371_p0 = scmp.lt.s32.totalorder %s1369_s27, %s1364_s15 }
  0x32   : > { %p1367_p10 = pnand %p1366_p9, %p1365_p8 }
  0x33   : > { %p1372_p2 = por %p1371_p0, %p1370_p13 }
  0x34   : > { %p1368_p11 = pneg %p1367_p10 }
  0x36   : > { %p1373_p5 = pnand %p1372_p2, %p1368_p11 }
  0x38   : > { %1376 = shalt.err (!%p1373_p5)
}
  0x39   : > { %1173 = dma.hbm_to_vmem [thread:$0]  (!%p1667_p7), %s349_s28, 64, %s351_s22, %s339_s11  }
  0x3a   : > { %s367_s29 = sshll.u32 %s365_s7, 4  ;;  %s361_s21 = scalar_lea.vmem [#allocation5], %s1658_s20  ;;  %s368_s29 = int_to_ptr.hbm [resolvable:$true] %s367_s29 }
  0x3b   : > { %s369_s25 = sshll.u32 %s361_s21, 4  ;;  %s358_s14 = scalar_lea.sflag [#allocation6], %s357_s26  ;;  %s370_s25 = int_to_ptr.vmem [resolvable:$true] %s369_s25 }
  0x3c   : > { %s1392_s19 = sshra.s32 %s368_s29, 4  ;;  %s1399_s27 = scalar_lea.hbm %s1778_s1, 8  ;;  %s1393_s19 = int_to_ptr.hbm [resolvable:$true] %s1392_s19 }
  0x3d   : > { %s1394_s12 = scalar_lea.hbm %s1393_s19, 4  ;;  %p1400_p5 = scmp.lt.s32.totalorder %s1393_s19, %s1778_s1 }
  0x3e   : > { %p1395_p8 = scmp.ne.s32.totalorder %s1393_s19, %s1394_s12  ;;  %p1401_p13 = scmp.lt.s32.totalorder %s1399_s27, %s1394_s12 }
  0x40   : > { %p1397_p10 = pnand %p1395_p8, %p1366_p9  ;;  %p1402_p0 = por %p1401_p13, %p1400_p5 }
  0x42   : > { %p1398_p11 = pneg %p1397_p10 }
  0x44   : > { %p1403_p2 = pnand %p1402_p0, %p1398_p11 }
  0x46   : > { %1406 = shalt.err (!%p1403_p2)
}
  0x47   : > { %1176 = dma.hbm_to_vmem [thread:$0]  (!%p1667_p7), %s368_s29, 64, %s370_s25, %s358_s14  }
  0x48   : > { %378 = sbr.rel (%p1592_p3) target bundleno = 804 (0x324), region = 56  ;;  %s1703_s7 = sand.u32 (!%p1592_p3), 1, %s1496_s10  }
  0x49   : > { %s964_s26 = sshll.u32 (!%p1592_p3), %s1703_s7, 2  ;;  %s381_s20 = scalar_lea.sflag (!%p1592_p3), [#allocation3], %s1703_s7 }
  0x4a   : > { %s1707_s22 = scalar_lea.vmem (!%p1592_p3), [#allocation2], %s964_s26 }
  0x4d   : > { %1467 = dma.done.wait (%p1643_p12), %s381_s20, 64  }
  0x4e   : > { %1469 = vsyncadd (%p1643_p12), %s381_s20, 4294967232  ;;  %s390_s2 = sand.u32 1, %s1587_s16   ;;  %s1714_s17 = scalar_lea.vmem [#allocation5], %s964_s26 }
  0x4f   : > { %s391_s12 = scalar_lea.sflag [#allocation6], %s390_s2 }
  0x50   : > { %1471 = dma.done.wait (%p1643_p12), %s391_s12, 64  }
  0x51   : > { %1473 = vsyncadd (%p1643_p12), %s391_s12, 4294967232 }
  0x52   : > { %1475 = dma.done.wait (%p51_p1), [#allocation6], 1024  }
  0x53   : > { %1477 = vsyncadd (%p51_p1), [#allocation6], 4294966272 }
  0x54   : > { %1479 = dma.done.wait (%p51_p1), [#allocation9], 2048  }
  0x55   : > { %1481 = vsyncadd (%p51_p1), [#allocation9], 4294965248 }
  0x56   : > { %1483 = dma.done.wait (%p51_p1), [#allocation12], 1024  }
  0x57   : > { %1485 = vsyncadd (%p51_p1), [#allocation12], 4294966272  ;;  %v1110_v0 = vld [vmem:[#allocation7 + $0x38] sm:$0xff]  ;;  %v1109_v1 = vld [vmem:[#allocation7 + $0x30] sm:$0xff]  ;;  %v1512_v26 = vmov 8.0   ;;  %s970_s14 = sshll.u32 %s1703_s7, 3 }
  0x58   : > { %524 = vmatpush.bf16.msra.mxu0 %v1110_v0  ;;  %v1126_v2 = vld [vmem:[#allocation8 + $0x38] sm:$0xff]  ;;  %v1125_v4 = vld [vmem:[#allocation8 + $0x30] sm:$0xff]  ;;  %v1108_v5 = vld [vmem:[#allocation7 + $0x28] sm:$0xff]  ;;  %1232 = vrcp.f32 %v1512_v26  ;;  %s1100_s19 = sshll.u32 %s1587_s16, 3  ;;  %s454_s4 = scalar_lea.vmem [#allocation13], %s970_s14 }
  0x59   : > { %v1118_v3 = vld [vmem:[#allocation10 + $0x38] sm:$0xff]  ;;  %697 = vmatpush.bf16.msra.mxu2 %v1126_v2  ;;  %v1117_v6 = vld [vmem:[#allocation10 + $0x30] sm:$0xff]  ;;  %v1124_v7 = vld [vmem:[#allocation8 + $0x28] sm:$0xff]  ;;  %s816_s27 = scalar_lea.hbm %s1786_s9, %s1100_s19  ;;  %s818_s11 = sshll.u32 %s454_s4, 4  ;;  %s819_s11 = int_to_ptr.vmem [resolvable:$true] %s818_s11 }
  0x5a   : > { %618 = vmatpush.bf16.msra.mxu1 %v1118_v3  ;;  %v1107_v8 = vld [vmem:[#allocation7 + $0x20] sm:$0xff]  ;;  %v1106_v10 = vld [vmem:[#allocation7 + $0x18] sm:$0xff]  ;;  %v1105_v11 = vld [vmem:[#allocation7 + $0x10] sm:$0xff]  ;;  %s820_s26 = sshll.u32 %s816_s27, 4  ;;  %s806_s20 = scalar_lea.sflag [#allocation4], %s1703_s7  ;;  %s821_s26 = int_to_ptr.hbm [resolvable:$true] %s820_s26 }
  0x5b   : > { %v1123_v9 = vld [vmem:[#allocation8 + $0x20] sm:$0xff]  ;;  %v1104_v12 = vld [vmem:[#allocation7 + $0x8] sm:$0xff]  ;;  %v455_v14 = vld [vmem:[%s1707_s22] sm:$0xf]  ;;  %s1436_s22 = sshra.s32 %s821_s26, 4  ;;  %s1437_s22 = int_to_ptr.hbm [resolvable:$true] %s1436_s22 }
  0x5c   : > { %525 = vmatpush.bf16.msra.mxu0 %v1109_v1  ;;  %v1103_v13 = vld [vmem:[#allocation7] sm:$0xff]  ;;  %v1122_v15 = vld [vmem:[#allocation8 + $0x18] sm:$0xff]  ;;  %v1116_v16 = vld [vmem:[#allocation10 + $0x28] sm:$0xff]  ;;  %s1438_s2 = scalar_lea.hbm %s1437_s22, 8  ;;  %p1443_p7 = scmp.lt.s32.totalorder %s1437_s22, %s1786_s9 }
  0x5d   : > { %698 = vmatpush.bf16.msra.mxu2 %v1125_v4  ;;  %v1121_v17 = vld [vmem:[#allocation8 + $0x10] sm:$0xff]  ;;  %v1115_v18 = vld [vmem:[#allocation10 + $0x20] sm:$0xff]  ;;  %v1120_v19 = vld [vmem:[#allocation8 + $0x8] sm:$0xff]  ;;  %p1439_p1 = scmp.ne.s32.totalorder %s1437_s22, %s1438_s2 }
  0x5e   : > { %619 = vmatpush.bf16.msra.mxu1 %v1117_v6  ;;  %v1114_v20 = vld [vmem:[#allocation10 + $0x18] sm:$0xff]  ;;  %v1119_v21 = vld [vmem:[#allocation8] sm:$0xff]  ;;  %v1113_v22 = vld [vmem:[#allocation10 + $0x10] sm:$0xff]  ;;  %v1233_v30 = vpop.eup %1232 }
  0x5f   : > { %v631_v23 = vld [vmem:[%s1714_s17] sm:$0xf]  ;;  %v1112_v24 = vld [vmem:[#allocation10 + $0x8] sm:$0xff]  ;;  %v1111_v25 = vld [vmem:[#allocation10] sm:$0xff]  ;;  %v545_v34 = vmul.f32 8.0, %v1233_v30  ;;  %vm549_vm0 = vweird.f32 %v1233_v30  ;;  %p1440_p3 = pnand %p1439_p1, %p1650_p4  ;;  %s1442_s17 = scalar_lea.hbm %s1786_s9, 16 }
  0x60   : > { %526 = vmatpush.bf16.msra.mxu0 %v1108_v5  ;;  %v1134_v27 = vld [vmem:[#allocation11 + $0x38] sm:$0xff]  ;;  %v1133_v28 = vld [vmem:[#allocation11 + $0x30] sm:$0xff]  ;;  %v1132_v32 = vld [vmem:[#allocation11 + $0x28] sm:$0xff]  ;;  %p1444_p9 = scmp.lt.s32.totalorder %s1442_s17, %s1438_s2 }
  0x61   : > { %699 = vmatpush.bf16.msra.mxu2 %v1124_v7  ;;  %780 = vmatpush.bf16.msra.mxu3 %v1134_v27  ;;  %v1230_v29 = vld [vmem:[%s1780_s3] ss:$0 sm:$0xff]  ;;  %v546_v35 = vsub.f32 1.0, %v545_v34  ;;  %v1131_v49 = vld [vmem:[#allocation11 + $0x20] sm:$0xff]  ;;  %v1130_v51 = vld [vmem:[#allocation11 + $0x18] sm:$0xff]  ;;  %p1441_p12 = pneg %p1440_p3 }
  0x62   : > { %620 = vmatpush.bf16.msra.mxu1 %v1116_v16  ;;  %v1129_v52 = vld [vmem:[#allocation11 + $0x10] sm:$0xff]  ;;  %v1128_v54 = vld [vmem:[#allocation11 + $0x8] sm:$0xff]  ;;  %v1127_v55 = vld [vmem:[#allocation11] sm:$0xff]  ;;  %p1445_p8 = por %p1444_p9, %p1443_p7 }
  0x63   : > { %v547_v39 = vmul.f32 %v1233_v30, %v546_v35  ;;  %v569_v56 = vld [vmem:[%s1783_s6] sm:$0x1] }
  0x64   : > { %527 = vmatpush.bf16.msra.mxu0 %v1107_v8  ;;  %v1231_v0 = vld [vmem:[%s1785_s8] ss:$0 sm:$0xff]  ;;  %p1446_p10 = pnand %p1445_p8, %p1441_p12 }
  0x65   : > { %700 = vmatpush.bf16.msra.mxu2 %v1123_v9  ;;  %781 = vmatpush.bf16.msra.mxu3 %v1133_v28  ;;  %v548_v42 = vadd.f32 %v1233_v30, %v547_v39 }
  0x66   : > { %621 = vmatpush.bf16.msra.mxu1 %v1115_v18 }
  0x67   : > { %v550_v45 = vsel %vm549_vm0, %v1233_v30, %v548_v42 }
  0x68   : > { %528 = vmatpush.bf16.msra.mxu0 %v1106_v10 }
  0x69   : > { %701 = vmatpush.bf16.msra.mxu2 %v1122_v15  ;;  %782 = vmatpush.bf16.msra.mxu3 %v1132_v32 }
  0x6a   : > { %622 = vmatpush.bf16.msra.mxu1 %v1114_v20 }
  0x6c   : > { %529 = vmatpush.bf16.msra.mxu0 %v1105_v11 }
  0x6d   : > { %702 = vmatpush.bf16.msra.mxu2 %v1121_v17  ;;  %783 = vmatpush.bf16.msra.mxu3 %v1131_v49 }
  0x6e   : > { %623 = vmatpush.bf16.msra.mxu1 %v1113_v22 }
  0x70   : > { %530 = vmatpush.bf16.msra.mxu0 %v1104_v12 }
  0x71   : > { %703 = vmatpush.bf16.msra.mxu2 %v1120_v19  ;;  %784 = vmatpush.bf16.msra.mxu3 %v1130_v51 }
  0x72   : > { %624 = vmatpush.bf16.msra.mxu1 %v1112_v24 }
  0x74   : > { %531 = vmatpush.bf16.msra.mxu0 %v1103_v13 }
  0x75   : > { %704 = vmatpush.bf16.msra.mxu2 %v1119_v21  ;;  %785 = vmatpush.bf16.msra.mxu3 %v1129_v52 }
  0x76   : > { %625 = vmatpush.bf16.msra.mxu1 %v1111_v25 }
  0x77   : > { %532 = vmatmul.bf16.vlgmr.msra.gmra.mxu0 %v455_v14 }
  0x78   : > { %705 = vmatmul.bf16.vlgmr.msra.gmra.mxu2 %v631_v23 }
  0x79   : > { %786 = vmatpush.bf16.msra.mxu3 %v1128_v54 }
  0x7d   : > { %787 = vmatpush.bf16.msra.mxu3 %v1127_v55 }
  0xf4   : > { %v533_v31 = vpop.f32.mrf.mxu0 }
  0xf5   : > { %v534_v33 = vadd.f32 %v1230_v29, %v533_v31 }
  0xf7   : > { %1234 = vtanh.f32 %v534_v33 }
  0xfb   : > { %v706_v50 = vpop.f32.mrf.mxu2 }
  0xfc   : > { %v535_v36 = vpop.f32.mrf.mxu0 }
  0xfd   : > { %v1235_v37 = vpop.eup %1234 }
  0xfe   : > { %v538_v38 = vrot.slane %v1235_v37, 4 }
 0x100   : > { %v539_v40 = vadd.f32 %v1235_v37, %v538_v38 }
 0x102   : > { %v540_v41 = vrot.slane %v539_v40, 2 }
 0x103   : > { %v708_v53 = vpop.f32.mrf.mxu2 }
 0x104   : > { %v541_v43 = vadd.f32 %v540_v41, %v539_v40 }
 0x106   : > { %v542_v44 = vrot.slane %v541_v43, 1 }
 0x108   : > { %v543_v46 = vadd.f32 %v542_v44, %v541_v43 }
 0x10a   : > { %v551_v47 = vmul.f32 %v550_v45, %v543_v46 }
 0x10c   : > { %v552_v48 = vpack.c.bf16 %v551_v47, %v551_v47 }
 0x10e   : > { %626 = vmatmul.bf16.vlgmr.msra.gmra.mxu1 %v552_v48 }
 0x18b   : > { %v627_v57 = vpop.f32.mrf.mxu1 }
 0x18c   : > { %v628_v58 = vadd.f32 %v627_v57, %v569_v56 }
 0x18e   : > { %v648_v59 = vperm.slane %v628_v58, 0 }
 0x190   : > { %v707_v60 = vadd.f32 %v706_v50, %v648_v59 }
 0x192   : > { %1236 = vtanh.f32 %v707_v60 }
 0x193   : > { %v629_v61 = vpop.f32.mrf.mxu1 }
 0x198   : > { %v1237_v62 = vpop.eup %1236 }
 0x199   : > { %v711_v63 = vpack.c.bf16 %v1237_v62, %v1237_v62 }
 0x19b   : > { %788 = vmatmul.bf16.vlgmr.msra.gmra.mxu3 %v711_v63 }
 0x21e   : > { %v789_v1 = vpop.f32.mrf.mxu3 }
 0x21f   : > { %v790_v2 = vadd.f32 %v1231_v0, %v789_v1 }
 0x221   : > { %793 = vmax.xlane.f32.xlu0 %v790_v2 }
 0x226   : > { %v791_v3 = vpop.f32.mrf.mxu3 }
 0x294   : > { %v794_v4 = vpop.xlane.xlu0 %793 }
 0x295   : > { %v795_v5 = vsub.f32 %v790_v2, %v794_v4 }
 0x297   : > { %v796_v6 = vmul.f32 1.442695, %v795_v5 }
 0x299   : > { %1238 = vpow2.f32 %v796_v6 }
 0x29f   : > { %v1239_v7 = vpop.eup %1238 }
 0x2a0   : > { %798 = vadd.xlane.f32.xlu0 %v1239_v7 }
 0x313   : > { %v799_v8 = vpop.xlane.xlu0 %798 }
 0x314   : > { %1240 = vlog2.f32 %v799_v8 }
 0x31a   : > { %v1241_v9 = vpop.eup %1240 }
 0x31b   : > { %v801_v10 = vmul.f32 0.6931472, %v1241_v9 }
 0x31d   : > { %v802_v11 = vadd.f32 %v801_v10, %v794_v4 }
 0x31f   : > { %v803_v12 = vsub.f32 %v790_v2, %v802_v11 }
 0x321   : > { %804 = vst [vmem:[%s454_s4] sm:$0xff] %v803_v12 }
 0x322   : > { %1449 = shalt.err (!%p1446_p10)
}
 0x323   : > { %1155 = dma.vmem_to_hbm [thread:$0]  (%p1650_p4), %s819_s11, 128, %s821_s26, %s806_s20  }
 0x324 PF: > { %s1810_s7 = sld [smem:[#allocation21_spill]]  ;;  %s832_s28 = sand.u32 1, %s1492_s30  }
 0x325   : > { %s833_s5 = scalar_lea.sflag [#allocation4], %s832_s28 }
 0x32a   : > { %p1811_p11 = scmp.ge.s32.totalorder %s1810_s7, 2 }
 0x32c   : > { %p1178_p5 = pnand %p1811_p11, %p1654_p6 }
 0x32e   : > { %p1179_p13 = pneg %p1178_p5 }
 0x330   : > { %1487 = dma.done.wait (%p1179_p13), %s833_s5, 128  }
 0x331   : > { %1489 = vsyncadd (%p1179_p13), %s833_s5, 4294967168  ;;  %s1812_s12 = sld [smem:[#allocation22_spill]]  ;;  %s1815_s30 = smov %s1496_s10 }
 0x332   : > { %s1813_s29 = sld [smem:[#allocation20_spill]] }
 0x333   : > { %s1814_s11 = sld [smem:[#allocation23_spill]] }
 0x337   : > { %p27_p0 = scmp.ge.s32.totalorder %s1812_s12, 4  }
 0x338   : > { %s1816_s10 = smov %s1813_s29 }
 0x339   :  { %29 = sbr.rel (!%p27_p0) target bundleno = 14 (0xe), region = 130 }
 0x33e   :  { %839 = vsyncpa [#allocation3], 1 }
 0x33f   :  { %841 = vsyncpa [#allocation3 + $0x1], 1 }
 0x340   :  { %842 = vsyncpa [#allocation6], 1 }
 0x341   :  { %844 = vsyncpa [#allocation6 + $0x1], 1 }
 0x342   :  { %845 = vsyncpa [#allocation9], 1 }
 0x343   :  { %846 = vsyncpa [#allocation12], 1 }
 0x344   :  { %847 = vsyncpa [#allocation4], 1 }
 0x345   :  { %849 = vsyncpa [#allocation4 + $0x1], 1 }

</bundles_post_ra>
